<compile_context>
chip_gen: v7x
topology: tpu7x:2x2x1
jax: 0.10.0
libtpu: 0.0.40
codegen_flags: <defaults>
</compile_context>

<pallas_src>
import functools

import jax
import jax.numpy as jnp
from jax import lax
from jax.experimental import pallas as pl
from jax.experimental.pallas import tpu as pltpu

LANES = 128
MAX_BLOCK_ROWS = 4096   # (4096, 128) f32 block = 2 MiB; 2 streams x 2 buffers = 8 MiB
NUM_CORES = 2           # outer parallel axis (both TCs on v7x; harmless on v5e/v6e)
VMEM_LIMIT_BYTES = 32 * 1024 * 1024   # <= physical VMEM on v5e/v6e/v7x


def _wbce_kernel(fp_w, fn_w, block_rows, inner_grid, last_block, tail_rows,
                 logits_ref, targets_ref, out_ref, acc_ref):
    c = pl.program_id(0)   # "parallel" (core) axis
    i = pl.program_id(1)   # "arbitrary" (reduction) axis
    logical_block = c * inner_grid + i
    has_tail = tail_rows != block_rows   # static Python bool

    @pl.when(i == 0)
    def _():
        acc_ref[...] = jnp.zeros_like(acc_ref)

    def contrib():
        x = logits_ref[...].astype(jnp.float32)
        y = targets_ref[...].astype(jnp.float32)
        # Numerically stable BCE-with-logits (matches torch.nn.BCEWithLogitsLoss):
        #   loss = max(x, 0) - x*y + log(1 + exp(-|x|))
        bce = jnp.maximum(x, 0.0) - x * y + jnp.log1p(jnp.exp(-jnp.abs(x)))
        # Exact module semantics: fp_w if y==0, fn_w if y==1, else 0.
        w = jnp.where(y == 0.0, jnp.float32(fp_w),
                      jnp.where(y == 1.0, jnp.float32(fn_w), jnp.float32(0.0)))
        return w * bce

    def fold(v):
        # Tile-aligned reshape (no relayout); elementwise add across vregs into
        # a single (8, 128) slab -> no per-data-vreg accumulator traffic.
        return jnp.sum(v.reshape(-1, 8, LANES), axis=0)

    # Hot path: full blocks, no masking at all.  Duplicated clamp blocks
    # (logical_block > last_block) hit neither branch and accumulate nothing.
    full_limit = last_block if has_tail else last_block + 1
    if full_limit > 0:
        @pl.when(logical_block < full_limit)
        def _():
            acc_ref[...] += fold(contrib())

    if has_tail:
        # Only the single partial tail block pays for row masking.  The masked
        # rows may hold garbage from the partial-block read; jnp.where is a
        # true select, so that garbage never reaches the accumulator.
        @pl.when(logical_block == last_block)
        def _():
            v = contrib()
            rows_iota = lax.broadcasted_iota(jnp.int32, v.shape, 0)
            acc_ref[...] += fold(jnp.where(rows_iota < tail_rows, v, 0.0))

    @pl.when(i == pl.num_programs(1) - 1)
    def _():
        total = jnp.sum(acc_ref[...])   # single cross-lane reduce per core
        r_io = lax.broadcasted_iota(jnp.int32, out_ref.shape, 0)
        l_io = lax.broadcasted_iota(jnp.int32, out_ref.shape, 1)
        out_ref[...] = jnp.where((r_io == 0) & (l_io == 0), total, 0.0)


def weighted_bce_loss(logits, targets, fp_weight=10.0, fn_weight=1.0):
    assert logits.shape == targets.shape
    n = int(logits.size)
    fp_w = float(fp_weight)
    fn_w = float(fn_weight)

    flat_l = logits.reshape(-1)
    flat_t = targets.reshape(-1)

    n_main = (n // LANES) * LANES   # 128-aligned prefix handled by the kernel
    n_tail = n - n_main             # <128-element lane tail handled in jnp

    total = jnp.float32(0.0)

    if n_main:
        l_main = flat_l if n_tail == 0 else flat_l[:n_main]
        t_main = flat_t if n_tail == 0 else flat_t[:n_main]
        rows = n_main // LANES
        l2d = l_main.reshape(rows, LANES)
        t2d = t_main.reshape(rows, LANES)

        # Block row count: multiple of 8 (vreg sublanes), capped for VMEM budget.
        block_rows = min(MAX_BLOCK_ROWS, ((rows + 7) // 8) * 8)
        num_blocks = -(-rows // block_rows)
        tail_rows = rows - (num_blocks - 1) * block_rows   # rows valid in last block
        inner_grid = -(-num_blocks // NUM_CORES)
        last_block = num_blocks - 1

        kernel = functools.partial(
            _wbce_kernel, fp_w, fn_w, int(block_rows), int(inner_grid),
            int(last_block), int(tail_rows))

        def in_map(c, i):
            # Clamp so an odd block count never indexes past the array; the
            # kernel skips accumulation for such duplicated blocks.
            return (jnp.minimum(c * inner_grid + i, last_block), 0)

        in_spec = pl.BlockSpec((block_rows, LANES), in_map)

        out = pl.pallas_call(
            kernel,
            out_shape=jax.ShapeDtypeStruct((NUM_CORES * 8, LANES), jnp.float32),
            grid_spec=pltpu.PrefetchScalarGridSpec(
                num_scalar_prefetch=0,
                grid=(NUM_CORES, inner_grid),
                in_specs=[in_spec, in_spec],
                out_specs=pl.BlockSpec((8, LANES), lambda c, i: (c, 0)),
                scratch_shapes=[pltpu.VMEM((8, LANES), jnp.float32)],
            ),
            compiler_params=pltpu.CompilerParams(
                dimension_semantics=("parallel", "arbitrary"),
                vmem_limit_bytes=VMEM_LIMIT_BYTES),
        )(l2d, t2d)
        total = total + jnp.sum(out)   # combine per-core partial sums

    if n_tail:
        # O(128) tail handled outside the kernel: avoids a full-array pad copy.
        xt = flat_l[n_main:].astype(jnp.float32)
        yt = flat_t[n_main:].astype(jnp.float32)
        bce_t = jnp.maximum(xt, 0.0) - xt * yt + jnp.log1p(jnp.exp(-jnp.abs(xt)))
        wt = jnp.where(yt == 0.0, jnp.float32(fp_w),
                       jnp.where(yt == 1.0, jnp.float32(fn_w), jnp.float32(0.0)))
        total = total + jnp.sum(wt * bce_t)

    return total / jnp.float32(n)


def _reference(logits, targets, fp_weight=10.0, fn_weight=1.0):
    x = logits.astype(jnp.float32)
    y = targets.astype(jnp.float32)
    bce = jnp.maximum(x, 0.0) - x * y + jnp.log1p(jnp.exp(-jnp.abs(x)))
    w = fp_weight * (y == 0.0) + fn_weight * (y == 1.0)
    return jnp.mean(w * bce)


if __name__ == "__main__":
    key = jax.random.PRNGKey(0)
    k1, k2, k3, k4 = jax.random.split(key, 4)

    # Small NCHW-shaped example, consistent with a segmentation-style usage.
    logits = jax.random.normal(k1, (2, 4, 16, 16), dtype=jnp.float32)
    targets = (jax.random.uniform(k2, (2, 4, 16, 16)) > 0.5).astype(jnp.float32)
    loss = weighted_bce_loss(logits, targets, fp_weight=10.0, fn_weight=1.0)
    loss = jax.block_until_ready(loss)
    ref = _reference(logits, targets, 10.0, 1.0)
    assert jnp.allclose(loss, ref, rtol=1e-5, atol=1e-5), (loss, ref)

    # Non-128-aligned size: exercises the partial-block row mask + lane tail.
    logits2 = jax.random.normal(k3, (3, 5, 7, 11), dtype=jnp.float32)
    targets2 = (jax.random.uniform(k4, (3, 5, 7, 11)) > 0.5).astype(jnp.float32)
    loss2 = weighted_bce_loss(logits2, targets2, fp_weight=10.0, fn_weight=1.0)
    loss2 = jax.block_until_ready(loss2)
    ref2 = _reference(logits2, targets2, 10.0, 1.0)
    assert jnp.allclose(loss2, ref2, rtol=1e-5, atol=1e-5), (loss2, ref2)

    print("KERNEL_OK")
</pallas_src>

<mosaic_0001>
module attributes {stable_mosaic.version = 11 : i64} {
  func.func @_wbce_kernel(%arg0: i32, %arg1: i32, %arg2: memref<16x128xf32, #tpu.memory_space<vmem>>, %arg3: memref<16x128xf32, #tpu.memory_space<vmem>>, %arg4: memref<8x128xf32, #tpu.memory_space<vmem>>, %arg5: memref<8x128xf32, #tpu.memory_space<vmem>>) attributes {dimension_semantics = [#tpu.dimension_semantics<parallel>, #tpu.dimension_semantics<arbitrary>], iteration_bounds = array<i64: 2, 1>, scalar_prefetch = 0 : i64, scratch_operands = 1 : i64, tpu.core_type = #tpu.core_type<tc>, window_params = [{transform_indices = @transform_0, window_bounds = array<i64: 16, 128>}, {transform_indices = @transform_1, window_bounds = array<i64: 16, 128>}, {transform_indices = @transform_2, window_bounds = array<i64: 8, 128>}]} {
    %c1_i32 = arith.constant 1 : i32
    %0 = arith.muli %arg0, %c1_i32 : i32
    %1 = arith.addi %0, %arg1 : i32
    %c0_i32 = arith.constant 0 : i32
    %2 = arith.cmpi eq, %arg1, %c0_i32 : i32
    %3 = arith.extui %2 : i1 to i32
    %c0_i32_0 = arith.constant 0 : i32
    %4 = arith.cmpi ne, %3, %c0_i32_0 : i32
    scf.if %4 {
      %cst = arith.constant 0.000000e+00 : f32
      %11 = vector.broadcast %cst : f32 to vector<8x128xf32>
      %c0 = arith.constant 0 : index
      %c0_5 = arith.constant 0 : index
      %12 = vector.load %arg5[%c0, %c0_5] : memref<8x128xf32, #tpu.memory_space<vmem>>, vector<8x128xf32>
      tpu.vector_store %arg5[%c0, %c0_5], %11 {strides = array<i32>} : memref<8x128xf32, #tpu.memory_space<vmem>>, vector<8x128xf32>,
    } else {
    }
    %c1_i32_1 = arith.constant 1 : i32
    %5 = arith.cmpi slt, %1, %c1_i32_1 : i32
    %6 = arith.extui %5 : i1 to i32
    %c0_i32_2 = arith.constant 0 : i32
    %7 = arith.cmpi ne, %6, %c0_i32_2 : i32
    scf.if %7 {
      %c0 = arith.constant 0 : index
      %c0_5 = arith.constant 0 : index
      %11 = vector.load %arg5[%c0, %c0_5] : memref<8x128xf32, #tpu.memory_space<vmem>>, vector<8x128xf32>
      %c0_6 = arith.constant 0 : index
      %c0_7 = arith.constant 0 : index
      %12 = vector.load %arg2[%c0_6, %c0_7] : memref<16x128xf32, #tpu.memory_space<vmem>>, vector<16x128xf32>
      %c0_8 = arith.constant 0 : index
      %c0_9 = arith.constant 0 : index
      %13 = vector.load %arg3[%c0_8, %c0_9] : memref<16x128xf32, #tpu.memory_space<vmem>>, vector<16x128xf32>
      %cst = arith.constant 0.000000e+00 : f32
      %14 = vector.broadcast %cst : f32 to vector<16x128xf32>
      %15 = arith.maximumf %12, %14 : vector<16x128xf32>
      %16 = arith.mulf %12, %13 : vector<16x128xf32>
      %17 = arith.subf %15, %16 : vector<16x128xf32>
      %18 = math.absf %12 : vector<16x128xf32>
      %cst_10 = arith.constant 0.000000e+00 : f32
      %19 = vector.broadcast %cst_10 : f32 to vector<16x128xf32>
      %20 = arith.subf %19, %18 : vector<16x128xf32>
      %21 = math.exp %20 : vector<16x128xf32>
      %22 = math.log1p %21 : vector<16x128xf32>
      %23 = arith.addf %17, %22 : vector<16x128xf32>
      %cst_11 = arith.constant 0.000000e+00 : f32
      %24 = vector.broadcast %cst_11 : f32 to vector<16x128xf32>
      %25 = arith.cmpf oeq, %13, %24 : vector<16x128xf32>
      %cst_12 = arith.constant 1.000000e+00 : f32
      %26 = vector.broadcast %cst_12 : f32 to vector<16x128xf32>
      %27 = arith.cmpf oeq, %13, %26 : vector<16x128xf32>
      %cst_13 = arith.constant 1.000000e+00 : f32
      %cst_14 = arith.constant 0.000000e+00 : f32
      %28 = vector.broadcast %cst_13 : f32 to vector<16x128xf32>
      %29 = vector.broadcast %cst_14 : f32 to vector<16x128xf32>
      %30 = arith.select %27, %28, %29 : vector<16x128xi1>, vector<16x128xf32>
      %cst_15 = arith.constant 1.000000e+01 : f32
      %31 = vector.broadcast %cst_15 : f32 to vector<16x128xf32>
      %32 = arith.select %25, %31, %30 : vector<16x128xi1>, vector<16x128xf32>
      %33 = arith.mulf %32, %23 : vector<16x128xf32>
      %34 = vector.shape_cast %33 : vector<16x128xf32> to vector<2x8x128xf32>
      %cst_16 = arith.constant dense<0.000000e+00> : vector<8x128xf32>
      %35 = vector.multi_reduction <add>, %34, %cst_16 [0] : vector<2x8x128xf32> to vector<8x128xf32>
      %36 = arith.addf %11, %35 : vector<8x128xf32>
      %c0_17 = arith.constant 0 : index
      %c0_18 = arith.constant 0 : index
      %37 = vector.load %arg5[%c0_17, %c0_18] : memref<8x128xf32, #tpu.memory_space<vmem>>, vector<8x128xf32>
      tpu.vector_store %arg5[%c0_17, %c0_18], %36 {strides = array<i32>} : memref<8x128xf32, #tpu.memory_space<vmem>>, vector<8x128xf32>,
    } else {
    }
    %c0_i32_3 = arith.constant 0 : i32
    %8 = arith.cmpi eq, %arg1, %c0_i32_3 : i32
    %9 = arith.extui %8 : i1 to i32
    %c0_i32_4 = arith.constant 0 : i32
    %10 = arith.cmpi ne, %9, %c0_i32_4 : i32
    scf.if %10 {
      %c0 = arith.constant 0 : index
      %c0_5 = arith.constant 0 : index
      %11 = vector.load %arg5[%c0, %c0_5] : memref<8x128xf32, #tpu.memory_space<vmem>>, vector<8x128xf32>
      %12 = vector.shape_cast %11 : vector<8x128xf32> to vector<1x8x128xf32>
      %cst = arith.constant dense<0.000000e+00> : vector<1xf32>
      %13 = vector.multi_reduction <add>, %12, %cst [1, 2] : vector<1x8x128xf32> to vector<1xf32>
      %14 = vector.shape_cast %13 : vector<1xf32> to vector<1x1x1xf32>
      %15 = vector.extract %14[0, 0, 0] : f32 from vector<1x1x1xf32>
      %16 = tpu.iota {dimensions = array<i32: 0>} : vector<8x128xi32>
      %17 = tpu.iota {dimensions = array<i32: 1>} : vector<8x128xi32>
      %c0_i32_6 = arith.constant 0 : i32
      %18 = vector.broadcast %c0_i32_6 : i32 to vector<8x128xi32>
      %19 = arith.cmpi eq, %16, %18 : vector<8x128xi32>
      %c0_i32_7 = arith.constant 0 : i32
      %20 = vector.broadcast %c0_i32_7 : i32 to vector<8x128xi32>
      %21 = arith.cmpi eq, %17, %20 : vector<8x128xi32>
      %22 = arith.andi %19, %21 : vector<8x128xi1>
      %cst_8 = arith.constant 0.000000e+00 : f32
      %23 = vector.broadcast %15 : f32 to vector<8x128xf32>
      %24 = vector.broadcast %cst_8 : f32 to vector<8x128xf32>
      %25 = arith.select %22, %23, %24 : vector<8x128xi1>, vector<8x128xf32>
      %c0_9 = arith.constant 0 : index
      %c0_10 = arith.constant 0 : index
      %26 = vector.load %arg4[%c0_9, %c0_10] : memref<8x128xf32, #tpu.memory_space<vmem>>, vector<8x128xf32>
      tpu.vector_store %arg4[%c0_9, %c0_10], %25 {strides = array<i32>} : memref<8x128xf32, #tpu.memory_space<vmem>>, vector<8x128xf32>,
    } else {
    }
    return
  }
  func.func @transform_0(%arg0: i32, %arg1: i32) -> (i32, i32) {
    %c1_i32 = arith.constant 1 : i32
    %0 = arith.muli %arg0, %c1_i32 : i32
    %1 = arith.addi %0, %arg1 : i32
    %c0_i32 = arith.constant 0 : i32
    %2 = arith.minsi %1, %c0_i32 : i32
    %c0_i32_0 = arith.constant 0 : i32
    %c0_i32_1 = arith.constant 0 : i32
    return %2, %c0_i32_0 : i32, i32
  }
  func.func @transform_1(%arg0: i32, %arg1: i32) -> (i32, i32) {
    %c1_i32 = arith.constant 1 : i32
    %0 = arith.muli %arg0, %c1_i32 : i32
    %1 = arith.addi %0, %arg1 : i32
    %c0_i32 = arith.constant 0 : i32
    %2 = arith.minsi %1, %c0_i32 : i32
    %c0_i32_0 = arith.constant 0 : i32
    %c0_i32_1 = arith.constant 0 : i32
    return %2, %c0_i32_0 : i32, i32
  }
  func.func @transform_2(%arg0: i32, %arg1: i32) -> (i32, i32) {
    %c0_i32 = arith.constant 0 : i32
    %c0_i32_0 = arith.constant 0 : i32
    return %arg0, %c0_i32 : i32, i32
  }
}

</mosaic_0001>

<bundles_post_ra>
// kernel: tpu_custom_call.1
= control target key start
LH: loop header
LB: loop body
LE: loop exit
PB: predicated region body
PF: predicated region fallthrough
CT: control target
= control target key end

     0   :  { %7 = vsyncpa [#allocation4], 0  ;;  %s973_s0 = inlined_call_operand.hbm [shape: f32[16,128], index: 0, kind: input, shape index: {}]   ;;  %s974_s1 = inlined_call_operand.hbm [shape: f32[16,128], index: 1, kind: input, shape index: {}]   ;;  %s975_s2 = inlined_call_operand.hbm [shape: f32[16,128], index: 2, kind: output, shape index: {}]  }
   0x1   :  { %9 = vsyncpa [#allocation4 + $0x1], 0 }
   0x2   :  { %10 = vsyncpa [#allocation7], 0 }
   0x3   :  { %12 = vsyncpa [#allocation7 + $0x1], 0 }
   0x4   :  { %13 = vsyncpa [#allocation5], 0 }
   0x5   :  { %15 = vsyncpa [#allocation5 + $0x1], 0  ;;  %s757_s9 = smov 0   ;;  %s759_s10 = smov 0  }
   0x6   :  { %s761_s11 = smov 0   ;;  %s763_s12 = smov 0  }
   0x7   :  { %s765_s13 = smov 0   ;;  %s767_s14 = smov 0  }
   0x8   :  { %s769_s15 = smov 0   ;;  %s771_s16 = smov 0  }
   0x9 LB: > { %s440_s17 = sadd.s32 4294967295, %s733_s16   ;;  %s441_s18 = sadd.s32 4294967294, %s733_s16   ;;  %s733_s16 = sphi %s771_s16, %s21_s16   ;;  %s729_s15 = sphi %s769_s15, %s994_s15   ;;  %s725_s14 = sphi %s767_s14, %s993_s14   ;;  %s721_s13 = sphi %s765_s13, %s963_s13   ;;  %s717_s12 = sphi %s763_s12, %s992_s12   ;;  %s713_s11 = sphi %s761_s11, %s991_s11   ;;  %s709_s10 = sphi %s759_s10, %s990_s10   ;;  %s705_s9 = sphi %s757_s9, %s989_s9  }
   0xa   : > { %s33_s19 = sadd.s32 1, %s729_s15  ;;  %p702_p1 = scmp.ne.s32.totalorder %s721_s13, 0 }
   0xb   : > { %p35_p0 = scmp.ge.s32.totalorder %s33_s19, 2  ;;  %p54_p2 = scmp.eq.s32.totalorder %s733_s16, 0 }
   0xc   : > { %p59_p3 = scmp.ne.s32.totalorder %s721_s13, %s717_s12  ;;  %p60_p5 = scmp.eq.s32.totalorder %s440_s17, 0 }
   0xd   : > { %s996_s19 = smov (%p35_p0, %s33_s19), 0  ;;  %p803_p4 = por %p702_p1, %p54_p2 }
   0xe   : > { %p807_p6 = por %p60_p5, %p59_p3  ;;  %s101_s22 = ssub.s32 %s729_s15, %s996_s19 }
   0xf   : > { %p102_p7 = scmp.eq.s32.totalorder %s101_s22, 0  ;;  %s104_s23 = sadd.s32 1, %s713_s11 }
  0x10   : > { %s979_s21 = scalar_select %p807_p6, 1, 0 }
  0x11   : > { %s815_s24 = scalar_select %p102_p7, %s713_s11, %s104_s23  }
  0x12   : > { %p114_p8 = scmp.ne.s32.totalorder %s713_s11, %s709_s10  ;;  %p115_p9 = scmp.eq.s32.totalorder %s440_s17, 1 }
  0x13   : > { %p120_p10 = scmp.ne.s32.totalorder %s709_s10, %s705_s9  ;;  %p121_p11 = scmp.eq.s32.totalorder %s441_s18, 1 }
  0x14   : > { %p821_p12 = por %p115_p9, %p114_p8  ;;  %p480_p1 = scmp.lt.s32.totalorder %s733_s16, 2 }
  0x15   : > { %p826_p0 = por %p121_p11, %p120_p10  ;;  %s735_s27 = smov [#allocation3]  }
  0x16   : > { %s980_s25 = scalar_select %p821_p12, 1, 0 }
  0x17   : > { %s981_s26 = scalar_select %p826_p0, 1, 0 }
  0x18   : > { %s155_s28 = sshll.u32 %s735_s27, 4  ;;  %p833_p2 = pnand %p480_p1, %p803_p4  ;;  %s156_s28 = int_to_ptr.vmem [resolvable:$true] %s155_s28 }
  0x19   : > { %s566_s4 = scalar_lea.hbm %s973_s0, 256 }
  0x1a   : > { %p567_p3 = scmp.ne.s32.totalorder %s973_s0, %s566_s4  ;;  %p568_p5 = pneg %p833_p2 }
  0x1b   : > { %p573_p8 = scmp.lt.u32.totalorder %s566_s4, %s566_s4  ;;  %p575_p9 = scmp.lt.u32.totalorder %s566_s4, %s973_s0 }
  0x1c   : > { %p569_p7 = pnand %p568_p5, %p567_p3 }
  0x1d   : > { %p576_p10 = por %p575_p9, %p573_p8 }
  0x1e   : > { %p570_p4 = pneg %p569_p7 }
  0x20   : > { %p577_p11 = pnand %p576_p10, %p570_p4 }
  0x22   : > { %580 = shalt.err (!%p577_p11)
}
  0x23   : > { %s581_s12 = scalar_lea.vmem %s156_s28, 256  ;;  %s588_s17 = scalar_lea.vmem %s156_s28, 512 }
  0x24   : > { %p582_p1 = scmp.ne.s32.totalorder %s156_s28, %s581_s12  ;;  %p589_p12 = scmp.lt.s32.totalorder %s156_s28, %s156_s28 }
  0x25   : > { %p590_p6 = scmp.lt.s32.totalorder %s588_s17, %s581_s12 }
  0x26   : > { %p584_p13 = pnand %p582_p1, %p568_p5 }
  0x27   : > { %p591_p3 = por %p590_p6, %p589_p12 }
  0x28   : > { %p585_p0 = pneg %p584_p13 }
  0x2a   : > { %p592_p7 = pnand %p591_p3, %p585_p0 }
  0x2c   : > { %595 = shalt.err (!%p592_p7)
}
  0x2d   : > { %s736_s18 = smov 128   ;;  %s737_s20 = smov 8  }
  0x2e   : > { %472 = dma.hbm_to_vmem [thread:$0]  (!%p833_p2), %s973_s0, 256, %s156_s28, [#allocation4], %s736_s18, %s736_s18, %s737_s20  }
  0x2f   : > { %p450_p13 = scmp.ge.s32.totalorder %s733_s16, 1  ;;  %p187_p4 = scmp.lt.s32.totalorder %s733_s16, 3 }
  0x30   : > { %s738_s30 = smov [#allocation6]   ;;  %s596_s6 = scalar_lea.hbm %s974_s1, 256 }
  0x31   : > { %p864_p8 = pnand %p450_p13, %p187_p4  ;;  %s179_s3 = sshll.u32 %s738_s30, 4  ;;  %s180_s3 = int_to_ptr.vmem [resolvable:$true] %s179_s3 }
  0x32   : > { %p597_p6 = scmp.ne.s32.totalorder %s974_s1, %s596_s6  ;;  %p603_p9 = scmp.lt.u32.totalorder %s596_s6, %s596_s6 }
  0x33   : > { %s983_s27 = scalar_select %p864_p8, 1, 0 }
  0x34   : > { %p599_p12 = pnand %p597_p6, %p568_p5  ;;  %p605_p10 = scmp.lt.u32.totalorder %s596_s6, %s974_s1 }
  0x36   : > { %p600_p0 = pneg %p599_p12  ;;  %p606_p11 = por %p605_p10, %p603_p9 }
  0x38   : > { %p607_p1 = pnand %p606_p11, %p600_p0 }
  0x3a   : > { %610 = shalt.err (!%p607_p1)
}
  0x3b   : > { %s611_s17 = scalar_lea.vmem %s180_s3, 256  ;;  %s618_s22 = scalar_lea.vmem %s180_s3, 512 }
  0x3c   : > { %p612_p3 = scmp.ne.s32.totalorder %s180_s3, %s611_s17  ;;  %p619_p4 = scmp.lt.s32.totalorder %s180_s3, %s180_s3 }
  0x3d   : > { %p620_p8 = scmp.lt.s32.totalorder %s618_s22, %s611_s17 }
  0x3e   : > { %p614_p7 = pnand %p612_p3, %p568_p5 }
  0x3f   : > { %p621_p6 = por %p620_p8, %p619_p4 }
  0x40   : > { %p615_p13 = pneg %p614_p7 }
  0x42   : > { %p622_p12 = pnand %p621_p6, %p615_p13 }
  0x44   : > { %625 = shalt.err (!%p622_p12)
}
  0x45   : > { %475 = dma.hbm_to_vmem [thread:$0]  (!%p833_p2), %s974_s1, 256, %s180_s3, [#allocation7], %s736_s18, %s736_s18, %s737_s20  }
  0x46   : > { %p984_p0 = scmp.ne.s32.totalorder %s983_s27, 0 }
  0x47   : > { %s193_s4 = sand.u32 (!%p984_p0), 1, %s721_s13   ;;  %p985_p5 = scmp.ne.s32.totalorder (!%p984_p0), %s979_s21, 0 }
  0x48   : > { %191 = sbr.rel (%p984_p0) target bundleno = 354 (0x162), region = 28  ;;  %s451_s5 = sshll.u32 (!%p984_p0), %s193_s4, 4 }
  0x49   : > { %s194_s6 = scalar_lea.sflag (!%p984_p0), [#allocation4], %s193_s4  ;;  %s197_s7 = scalar_lea.vmem (!%p984_p0), [#allocation3], %s451_s5 }
  0x4f   : > { %691 = dma.done.wait (%p985_p5), %s194_s6, 256  }
  0x50   : > { %693 = vsyncadd (%p985_p5), %s194_s6, 4294967040  ;;  %s203_s29 = scalar_lea.sflag [#allocation7], %s193_s4  ;;  %s206_s8 = scalar_lea.vmem [#allocation6], %s451_s5 }
  0x51   : > { %695 = dma.done.wait (%p985_p5), %s203_s29, 256  }
  0x52   : > { %697 = vsyncadd (%p985_p5), %s203_s29, 4294967040  ;;  %s229_s18 = sand.u32 1, %s709_s10   ;;  %v739_v0 = vmov 0.0   ;;  %p454_p2 = scmp.ge.s32.totalorder %s725_s14, 1 }
  0x53   : > { %s905_s20 = sshll.u32 %s229_s18, 3  ;;  %245 = vst [vmem:[#allocation2] sm:$0xff] %v739_v0  ;;  %v251_v1 = vld [vmem:[%s197_s7] sm:$0xff] (!%p454_p2)  ;;  %v252_v2 = vld [vmem:[%s197_s7 + $0x8] sm:$0xff] (!%p454_p2)  ;;  %v740_v29 = vmov (!%p454_p2), 0.0  }
  0x54   : > { %s231_s27 = scalar_lea.vmem [#allocation8], %s905_s20  ;;  %249 = sbr.rel (%p454_p2) target bundleno = 127 (0x7f), region = 44  ;;  %v261_v3 = vand.u32 (!%p454_p2), 2147483647, %v251_v1  ;;  %v262_v4 = vand.u32 (!%p454_p2), 2147483647, %v252_v2 }
  0x55   : > { %v253_v15 = vld [vmem:[%s206_s8] sm:$0xff] (!%p454_p2)  ;;  %v254_v16 = vld [vmem:[%s206_s8 + $0x8] sm:$0xff] (!%p454_p2)  ;;  %v255_v18 = vmax.f32 (!%p454_p2), %v251_v1, 0.0  ;;  %v256_v22 = vmax.f32 (!%p454_p2), %v252_v2, 0.0 }
  0x56   : > { %v263_v5 = vsub.f32 (!%p454_p2), 0.0, %v261_v3  ;;  %v264_v6 = vsub.f32 (!%p454_p2), 0.0, %v262_v4  ;;  %v257_v19 = vmul.f32 (!%p454_p2), %v253_v15, %v251_v1  ;;  %v258_v23 = vmul.f32 (!%p454_p2), %v254_v16, %v252_v2 }
  0x57   : > { %vm291_vm0 = vcmp.eq.f32.partialorder (!%p454_p2), %v253_v15, 1.0  ;;  %vm292_vm1 = vcmp.eq.f32.partialorder (!%p454_p2), %v254_v16, 1.0  ;;  %vm289_vm2 = vcmp.eq.f32.partialorder (!%p454_p2), %v253_v15, 0.0  ;;  %vm290_vm3 = vcmp.eq.f32.partialorder (!%p454_p2), %v254_v16, 0.0 }
  0x58   : > { %v265_v7 = vmul.f32 (!%p454_p2), 1.442695, %v263_v5  ;;  %v267_v8 = vmul.f32 (!%p454_p2), 1.442695, %v264_v6  ;;  %v259_v27 = vsub.f32 (!%p454_p2), %v255_v18, %v257_v19  ;;  %v293_v30 = vsel (!%p454_p2), %vm291_vm0, 1.0, %v740_v29 }
  0x59   : > { %v260_v32 = vsub.f32 (!%p454_p2), %v256_v22, %v258_v23  ;;  %v294_v34 = vsel (!%p454_p2), %vm292_vm1, 1.0, %v740_v29  ;;  %v295_v37 = vsel (!%p454_p2), %vm289_vm2, 10.0, %v293_v30 }
  0x5a   : > { %558 = vpow2.f32 (!%p454_p2), %v265_v7  ;;  %v296_v40 = vsel (!%p454_p2), %vm290_vm3, 10.0, %v294_v34  ;;  %v250_v44 = vld [vmem:[#allocation2] sm:$0xff] (!%p454_p2) }
  0x5b   : > { %560 = vpow2.f32 %v267_v8 }
  0x64   : > { %v559_v9 = vpop.eup %558 }
  0x65   : > { %v561_v10 = vpop.eup %560  ;;  %v269_v11 = vadd.f32 1.0, %v559_v9  ;;  %v272_v13 = vmul.f32 -0.5, %v559_v9  ;;  %v275_v20 = vand.u32 2147483647, %v559_v9 }
  0x66   : > { %v278_v12 = vadd.f32 1.0, %v561_v10  ;;  %v281_v14 = vmul.f32 -0.5, %v561_v10  ;;  %v284_v24 = vand.u32 2147483647, %v561_v10 }
  0x67   : > { %562 = vlog2.f32 %v269_v11  ;;  %v273_v17 = vadd.f32 1.0, %v272_v13  ;;  %vm276_vm4 = vcmp.lt.f32.partialorder %v275_v20, 0.0004427343 }
  0x68   : > { %564 = vlog2.f32 %v278_v12  ;;  %v282_v21 = vadd.f32 1.0, %v281_v14  ;;  %vm285_vm5 = vcmp.lt.f32.partialorder %v284_v24, 0.0004427343 }
  0x69   : > { %v274_v25 = vmul.f32 %v559_v9, %v273_v17 }
  0x6a   : > { %v283_v28 = vmul.f32 %v561_v10, %v282_v21 }
  0x71   : > { %v563_v26 = vpop.eup %562 }
  0x72   : > { %v565_v31 = vpop.eup %564  ;;  %v271_v33 = vmul.f32 0.6931472, %v563_v26 }
  0x73   : > { %v280_v35 = vmul.f32 0.6931472, %v565_v31 }
  0x74   : > { %v277_v36 = vsel %vm276_vm4, %v274_v25, %v271_v33 }
  0x75   : > { %v286_v38 = vsel %vm285_vm5, %v283_v28, %v280_v35  ;;  %v287_v39 = vadd.f32 %v277_v36, %v259_v27 }
  0x76   : > { %v288_v41 = vadd.f32 %v286_v38, %v260_v32 }
  0x77   : > { %v297_v42 = vmul.f32 %v295_v37, %v287_v39 }
  0x78   : > { %v298_v43 = vmul.f32 %v296_v40, %v288_v41 }
  0x7a   : > { %v299_v45 = vadd.f32 %v298_v43, %v297_v42 }
  0x7c   : > { %v300_v46 = vadd.f32 %v299_v45, %v250_v44 }
  0x7e   : > { %301 = vst [vmem:[#allocation2] sm:$0xff] %v300_v46 }
  0x7f PF: > { %v315_v55 = vlaneseq  ;;  %s456_s21 = sshll.u32 %s725_s14, 7  ;;  %s339_s3 = sshll.u32 %s231_s27, 4  ;;  %s918_s3 = int_to_ptr.vmem [resolvable:$true] %s339_s3 }
  0x80   : > { %s916_s22 = scalar_lea.hbm %s975_s2, %s456_s21  ;;  %s326_s14 = scalar_lea.sflag [#allocation5], %s229_s18 }
  0x81   : > { %v316_v56 = vshrl.u32 %v315_v55, 7  ;;  %v318_v57 = vand.u32 127, %v315_v55  ;;  %s626_s23 = scalar_lea.vmem %s918_s3, 128  ;;  %p986_p9 = scmp.ne.s32.totalorder %s980_s25, 0 }
  0x82   : > { %p627_p8 = scmp.ne.s32.totalorder %s918_s3, %s626_s23  ;;  %s741_s30 = smov [#allocation8]  }
  0x83   : > { %vm319_vm6 = vcmp.eq.s32.totalorder %v316_v56, 0  ;;  %vm320_vm7 = vcmp.eq.s32.totalorder %v318_v57, 0  ;;  %s630_s4 = sshll.u32 %s741_s30, 4  ;;  %s631_s4 = int_to_ptr.vmem [resolvable:$false] %s630_s4 }
  0x84   : > { %vm321_vm8 = vmand %vm319_vm6, %vm320_vm7  ;;  %p628_p10 = pnand %p627_p8, %p986_p9  ;;  %s632_s5 = scalar_lea.vmem %s631_s4, 256 }
  0x85   : > { %v305_v47 = vld [vmem:[#allocation2] sm:$0xff]  ;;  %p633_p1 = scmp.lt.s32.totalorder %s918_s3, %s631_s4  ;;  %p634_p3 = scmp.lt.s32.totalorder %s632_s5, %s626_s23 }
  0x86   : > { %306 = vadd.xlane.f32.xlu0 %v305_v47  ;;  %p629_p11 = pneg %p628_p10 }
  0x87   : > { %p635_p7 = por %p634_p3, %p633_p1 }
  0x89   : > { %p636_p13 = pnand %p635_p7, %p629_p11 }
 0x113   : > { %v307_v48 = vpop.xlane.xlu0 %306 }
 0x114   : > { %v308_v49 = vrot.slane %v307_v48, 4 }
 0x116   : > { %v309_v50 = vadd.f32 %v308_v49, %v307_v48 }
 0x118   : > { %v310_v51 = vrot.slane %v309_v50, 2 }
 0x11a   : > { %v311_v52 = vadd.f32 %v310_v51, %v309_v50 }
 0x11c   : > { %v312_v53 = vrot.slane %v311_v52, 1 }
 0x11e   : > { %v313_v54 = vadd.f32 %v312_v53, %v311_v52 }
 0x120   : > { %461 = vpush %v313_v54 }
 0x151   : > { %s462_s28 = spop %461 }
 0x152   : > { %v322_v58 = vstv %s462_s28 }
 0x153   : > { %v323_v59 = vsel %vm321_vm8, %v322_v58, 0.0 }
 0x154   : > { %324 = vst [vmem:[%s231_s27] sm:$0xff] %v323_v59 }
 0x155   : > { %639 = shalt.err (!%p636_p13)
}
 0x156   : > { %s640_s6 = scalar_lea.hbm %s916_s22, 128  ;;  %s644_s8 = scalar_lea.hbm %s975_s2, 256 }
 0x157   : > { %p641_p4 = scmp.ne.s32.totalorder %s916_s22, %s640_s6  ;;  %p645_p0 = scmp.lt.u32.totalorder %s916_s22, %s975_s2 }
 0x158   : > { %p646_p5 = scmp.lt.u32.totalorder %s644_s8, %s640_s6  ;;  %p648_p8 = scmp.lt.u32.totalorder %s640_s6, %s916_s22 }
 0x159   : > { %p642_p6 = pnand %p641_p4, %p986_p9 }
 0x15a   : > { %p647_p2 = por %p646_p5, %p645_p0 }
 0x15b   : > { %p643_p12 = pneg %p642_p6 }
 0x15c   : > { %p649_p10 = por %p648_p8, %p647_p2 }
 0x15e   : > { %p650_p11 = pnand %p649_p10, %p643_p12 }
 0x160   : > { %653 = shalt.err (!%p650_p11)
}
 0x161   : > { %467 = dma.vmem_to_hbm [thread:$0]  (%p986_p9), %s918_s3, 128, %s916_s22, %s326_s14  }
 0x162 PF: > { %s351_s27 = sand.u32 1, %s705_s9   ;;  %p987_p1 = scmp.ne.s32.totalorder %s981_s26, 0 }
 0x163   : > { %p988_p3 = scmp.ge.s32.totalorder %s733_s16, 2  ;;  %s352_s21 = scalar_lea.sflag [#allocation5], %s351_s27 }
 0x165   : > { %p477_p7 = pnand %p988_p3, %p987_p1 }
 0x167   : > { %699 = dma.done.wait (!%p477_p7), %s352_s21, 128  }
 0x168   : > { %701 = vsyncadd (!%p477_p7), %s352_s21, 4294967168  ;;  %s21_s16 = sadd.s32 1, %s733_s16   ;;  %s989_s9 = smov %s709_s10 }
 0x169   : > { %p18_p13 = scmp.ge.s32.totalorder %s21_s16, 4   ;;  %s990_s10 = smov %s713_s11 }
 0x16a   : > { %s991_s11 = smov %s815_s24  ;;  %s992_s12 = smov %s721_s13 }
 0x16b   : > { %s963_s13 = smov 0   ;;  %s993_s14 = smov %s729_s15 }
 0x16c   : > { %s994_s15 = smov %s996_s19  ;;  %20 = sbr.rel (!%p18_p13) target bundleno = 9 (0x9), region = 98 }
 0x173   :  { %357 = vsyncpa [#allocation4], 1 }
 0x174   :  { %359 = vsyncpa [#allocation4 + $0x1], 1 }
 0x175   :  { %360 = vsyncpa [#allocation7], 1 }
 0x176   :  { %362 = vsyncpa [#allocation7 + $0x1], 1 }
 0x177   :  { %363 = vsyncpa [#allocation5], 1 }
 0x178   :  { %365 = vsyncpa [#allocation5 + $0x1], 1 }

</bundles_post_ra>
